<compile_context>
chip_gen: v5e
topology: v5e:2x2
jax: 0.10.0
libtpu: 0.0.40
codegen_flags: <defaults>
</compile_context>

<pallas_src>
import functools

import jax
import jax.numpy as jnp
from jax.experimental import pallas as pl
from jax.experimental.pallas import tpu as pltpu


# ----------------------- fused GRU recurrence + readout kernel ----------------
def _gru_readout_kernel(*refs, n_readout, total_t, static_steps):
    (gi_r_ref, gi_z_ref, gi_n_ref,
     w_hr_ref, w_hz_ref, w_hn_ref, b_hn_ref) = refs[:7]
    ro_refs = refs[7:7 + 2 * n_readout]
    out_ref = refs[7 + 2 * n_readout]
    h_ref = refs[8 + 2 * n_readout]          # VMEM scratch, persists across chunks

    c = pl.program_id(0)
    t_chunk, B, H = gi_r_ref.shape

    @pl.when(c == 0)
    def _init():
        h_ref[...] = jnp.zeros_like(h_ref)

    # Weights stay VMEM-resident (constant block index); load once per grid step.
    w_hr = w_hr_ref[...]
    w_hz = w_hz_ref[...]
    w_hn = w_hn_ref[...]
    # Hoist the bias broadcast out of the time loop (JAX does not CSE broadcasts).
    b_hn = jnp.broadcast_to(b_hn_ref[...], (B, H))

    # Number of valid timesteps in this chunk (handles a ragged last chunk).
    if static_steps is not None:
        steps = static_steps                               # Python int -> static loop
    else:
        steps = jnp.minimum(t_chunk, total_t - c * t_chunk)

    def step(t, h):
        gh_r = jnp.dot(h, w_hr, preferred_element_type=jnp.float32)
        gh_z = jnp.dot(h, w_hz, preferred_element_type=jnp.float32)
        gh_n = jnp.dot(h, w_hn, preferred_element_type=jnp.float32)
        # gi_* already contain b_i* (+ b_hr / b_hz for the r/z gates).
        r = jax.nn.sigmoid(gi_r_ref[t] + gh_r)
        z = jax.nn.sigmoid(gi_z_ref[t] + gh_z)
        n = jnp.tanh(gi_n_ref[t] + r * (gh_n + b_hn))
        return (1.0 - z) * n + z * h

    h = jax.lax.fori_loop(0, steps, step, h_ref[...])
    h_ref[...] = h

    # Fused dense readout, run exactly once on the final hidden state.
    @pl.when(c == pl.num_programs(0) - 1)
    def _final():
        y = h
        for i in range(n_readout):
            w = ro_refs[2 * i][...]
            b = ro_refs[2 * i + 1][...]
            y = jnp.dot(y, w, preferred_element_type=jnp.float32) + b
            if i < n_readout - 1:
                y = jnp.maximum(y, 0.0)
        out_ref[...] = y.astype(out_ref.dtype)


# ----------------------------- full module forward ----------------------------
def gru_model_forward(x, params, t_chunk=256):
    """x: (B, T, feat_in). Returns (B, 1, num_forward * num_out_site)."""
    B, T, F = x.shape
    w_ih_t = params["w_ih_t"]            # (F, 3H)
    w_hh_t = params["w_hh_t"]            # (H, 3H)
    b_ih = params["b_ih"]                # (3H,)
    b_hh = params["b_hh"]                # (3H,)
    H = w_hh_t.shape[0]

    # ---- hoisted, non-recurrent input projection (one batched matmul in XLA) ----
    # Fold b_ih fully and the r/z parts of b_hh into the projection bias; b_hn must
    # remain inside the recurrence (r * (W_hn h + b_hn)).
    bias_gi = b_ih + jnp.concatenate([b_hh[:2 * H], jnp.zeros((H,), b_hh.dtype)])
    gi = jnp.einsum("btf,fg->tbg", x, w_ih_t,
                    precision=jax.lax.Precision.HIGHEST) + bias_gi      # (T, B, 3H)
    gi_r, gi_z, gi_n = jnp.split(gi, 3, axis=-1)      # each (T, B, H), lane-0 aligned

    # Per-gate recurrent weights so each gate matmul output starts at lane 0.
    w_hr, w_hz, w_hn = jnp.split(w_hh_t, 3, axis=1)   # each (H, H)
    b_hn = b_hh[2 * H:].reshape(1, H)

    ro_w = params["readout_w"]
    ro_b = params["readout_b"]
    n_readout = len(ro_w)
    out_dim = ro_w[-1].shape[1]
    ro_flat = []
    for w, b in zip(ro_w, ro_b):
        ro_flat += [w, b.reshape(1, -1)]

    tc = min(t_chunk, T)
    n_chunks = pl.cdiv(T, tc)
    # Single-chunk (or evenly divisible) grids get a static inner trip count.
    static_steps = tc if (T % tc == 0) else None

    gate_spec = pl.BlockSpec((tc, B, H), lambda c: (c, 0, 0))

    def const_spec(shape):
        return pl.BlockSpec(shape, lambda c: (0, 0))

    in_specs = [gate_spec, gate_spec, gate_spec,
                const_spec((H, H)), const_spec((H, H)), const_spec((H, H)),
                const_spec((1, H))]
    for w, b in zip(ro_w, ro_b):
        in_specs += [const_spec(w.shape), const_spec((1, b.shape[0]))]

    grid_spec = pltpu.PrefetchScalarGridSpec(
        num_scalar_prefetch=0,
        grid=(n_chunks,),
        in_specs=in_specs,
        out_specs=pl.BlockSpec((B, out_dim), lambda c: (0, 0)),
        scratch_shapes=[pltpu.VMEM((B, H), jnp.float32)],
    )

    kernel = functools.partial(_gru_readout_kernel,
                               n_readout=n_readout, total_t=T,
                               static_steps=static_steps)

    out = pl.pallas_call(
        kernel,
        out_shape=jax.ShapeDtypeStruct((B, out_dim), jnp.float32),
        grid_spec=grid_spec,
        compiler_params=pltpu.CompilerParams(
            # Chunks over time carry h sequentially -> must stay arbitrary/sequential.
            dimension_semantics=("arbitrary",)),
    )(gi_r, gi_z, gi_n, w_hr, w_hz, w_hn, b_hn, *ro_flat)

    return out[:, None, :]                # .unsqueeze(1)


# ------------------------ deterministic param init ---------------------------
def init_params(key, feat_in, feat_out, num_readout_layer, num_out_site, num_forward):
    keys = jax.random.split(key, 8 + 2 * num_readout_layer)
    k = 1.0 / jnp.sqrt(feat_out)
    # PyTorch layout: weight_ih (3H, F), weight_hh (3H, H); stored transposed.
    w_ih = jax.random.uniform(keys[0], (3 * feat_out, feat_in), jnp.float32, -k, k)
    w_hh = jax.random.uniform(keys[1], (3 * feat_out, feat_out), jnp.float32, -k, k)
    b_ih = jax.random.uniform(keys[2], (3 * feat_out,), jnp.float32, -k, k)
    b_hh = jax.random.uniform(keys[3], (3 * feat_out,), jnp.float32, -k, k)

    out_dim = num_forward * num_out_site
    dims = [feat_out] * num_readout_layer + [out_dim]
    readout_w, readout_b = [], []
    for i in range(num_readout_layer):
        d_in, d_out = dims[i], dims[i + 1]
        kw = 1.0 / jnp.sqrt(d_in)
        readout_w.append(jax.random.uniform(keys[4 + 2 * i], (d_in, d_out),
                                            jnp.float32, -kw, kw))
        readout_b.append(jax.random.uniform(keys[5 + 2 * i], (d_out,),
                                            jnp.float32, -kw, kw))
    return {
        "w_ih_t": w_ih.T, "w_hh_t": w_hh.T, "b_ih": b_ih, "b_hh": b_hh,
        "readout_w": readout_w, "readout_b": readout_b,
    }


# ----------------------------- pure-JAX reference ----------------------------
def reference_forward(x, params):
    H = params["w_hh_t"].shape[0]
    P = jax.lax.Precision.HIGHEST

    def step(h, x_t):
        gi = jnp.dot(x_t, params["w_ih_t"], precision=P) + params["b_ih"]
        gh = jnp.dot(h, params["w_hh_t"], precision=P) + params["b_hh"]
        r = jax.nn.sigmoid(gi[:, :H] + gh[:, :H])
        z = jax.nn.sigmoid(gi[:, H:2 * H] + gh[:, H:2 * H])
        n = jnp.tanh(gi[:, 2 * H:] + r * gh[:, 2 * H:])
        return (1.0 - z) * n + z * h, None

    h0 = jnp.zeros((x.shape[0], H), jnp.float32)
    h, _ = jax.lax.scan(step, h0, jnp.transpose(x, (1, 0, 2)))
    for i, (w, b) in enumerate(zip(params["readout_w"], params["readout_b"])):
        h = jnp.dot(h, w, precision=P) + b
        if i < len(params["readout_w"]) - 1:
            h = jnp.maximum(h, 0.0)
    return h[:, None, :]


# ---------------------------------- main --------------------------------------
if __name__ == "__main__":
    feat_in, feat_out = 16, 32
    num_readout_layer, num_out_site, num_forward = 2, 3, 1
    B, T = 4, 8

    key = jax.random.PRNGKey(0)
    k_x, k_p = jax.random.split(key)
    x = jax.random.normal(k_x, (B, T, feat_in), jnp.float32)
    params = init_params(k_p, feat_in, feat_out, num_readout_layer,
                         num_out_site, num_forward)

    fwd = jax.jit(gru_model_forward)
    out = jax.block_until_ready(fwd(x, params))

    ref = reference_forward(x, params)
    assert out.shape == (B, 1, num_forward * num_out_site), out.shape
    max_err = jnp.max(jnp.abs(out - ref))
    assert jnp.allclose(out, ref, atol=1e-4, rtol=1e-4), f"max abs err {max_err}"

    print("KERNEL_OK")
</pallas_src>

<mosaic_0001>
module attributes {stable_mosaic.version = 11 : i64} {
  func.func @_gru_readout_kernel(%arg0: i32, %arg1: memref<8x4x32xf32, #tpu.memory_space<vmem>>, %arg2: memref<8x4x32xf32, #tpu.memory_space<vmem>>, %arg3: memref<8x4x32xf32, #tpu.memory_space<vmem>>, %arg4: memref<32x32xf32, #tpu.memory_space<vmem>>, %arg5: memref<32x32xf32, #tpu.memory_space<vmem>>, %arg6: memref<32x32xf32, #tpu.memory_space<vmem>>, %arg7: memref<1x32xf32, #tpu.memory_space<vmem>>, %arg8: memref<32x32xf32, #tpu.memory_space<vmem>>, %arg9: memref<1x32xf32, #tpu.memory_space<vmem>>, %arg10: memref<32x3xf32, #tpu.memory_space<vmem>>, %arg11: memref<1x3xf32, #tpu.memory_space<vmem>>, %arg12: memref<4x3xf32, #tpu.memory_space<vmem>>, %arg13: memref<4x32xf32, #tpu.memory_space<vmem>>) attributes {dimension_semantics = [#tpu.dimension_semantics<arbitrary>], iteration_bounds = array<i64: 1>, scalar_prefetch = 0 : i64, scratch_operands = 1 : i64, tpu.core_type = #tpu.core_type<tc>, window_params = [{transform_indices = @transform_0, window_bounds = array<i64: 8, 4, 32>}, {transform_indices = @transform_1, window_bounds = array<i64: 8, 4, 32>}, {transform_indices = @transform_2, window_bounds = array<i64: 8, 4, 32>}, {pipeline_mode = #tpu.pipeline_mode<synchronous>, transform_indices = @transform_3, window_bounds = array<i64: 32, 32>}, {pipeline_mode = #tpu.pipeline_mode<synchronous>, transform_indices = @transform_4, window_bounds = array<i64: 32, 32>}, {pipeline_mode = #tpu.pipeline_mode<synchronous>, transform_indices = @transform_5, window_bounds = array<i64: 32, 32>}, {pipeline_mode = #tpu.pipeline_mode<synchronous>, transform_indices = @transform_6, window_bounds = array<i64: 1, 32>}, {pipeline_mode = #tpu.pipeline_mode<synchronous>, transform_indices = @transform_7, window_bounds = array<i64: 32, 32>}, {pipeline_mode = #tpu.pipeline_mode<synchronous>, transform_indices = @transform_8, window_bounds = array<i64: 1, 32>}, {pipeline_mode = #tpu.pipeline_mode<synchronous>, transform_indices = @transform_9, window_bounds = array<i64: 32, 3>}, {pipeline_mode = #tpu.pipeline_mode<synchronous>, transform_indices = @transform_10, window_bounds = array<i64: 1, 3>}, {pipeline_mode = #tpu.pipeline_mode<synchronous>, transform_indices = @transform_11, window_bounds = array<i64: 4, 3>}]} {
    %c0_i32 = arith.constant 0 : i32
    %0 = arith.cmpi eq, %arg0, %c0_i32 : i32
    %1 = arith.extui %0 : i1 to i32
    %c0_i32_0 = arith.constant 0 : i32
    %2 = arith.cmpi ne, %1, %c0_i32_0 : i32
    scf.if %2 {
      %cst = arith.constant 0.000000e+00 : f32
      %16 = vector.broadcast %cst : f32 to vector<4x32xf32>
      %c0_16 = arith.constant 0 : index
      %c0_17 = arith.constant 0 : index
      %17 = vector.load %arg13[%c0_16, %c0_17] : memref<4x32xf32, #tpu.memory_space<vmem>>, vector<4x32xf32>
      tpu.vector_store %arg13[%c0_16, %c0_17], %16 {strides = array<i32>} : memref<4x32xf32, #tpu.memory_space<vmem>>, vector<4x32xf32>,
    } else {
    }
    %c0 = arith.constant 0 : index
    %c0_1 = arith.constant 0 : index
    %3 = vector.load %arg4[%c0, %c0_1] : memref<32x32xf32, #tpu.memory_space<vmem>>, vector<32x32xf32>
    %c0_2 = arith.constant 0 : index
    %c0_3 = arith.constant 0 : index
    %4 = vector.load %arg5[%c0_2, %c0_3] : memref<32x32xf32, #tpu.memory_space<vmem>>, vector<32x32xf32>
    %c0_4 = arith.constant 0 : index
    %c0_5 = arith.constant 0 : index
    %5 = vector.load %arg6[%c0_4, %c0_5] : memref<32x32xf32, #tpu.memory_space<vmem>>, vector<32x32xf32>
    %c0_6 = arith.constant 0 : index
    %c0_7 = arith.constant 0 : index
    %6 = vector.load %arg7[%c0_6, %c0_7] : memref<1x32xf32, #tpu.memory_space<vmem>>, vector<1x32xf32>
    %7 = vector.shape_cast %6 : vector<1x32xf32> to vector<1x32xf32>
    %8 = vector.broadcast %7 : vector<1x32xf32> to vector<4x32xf32>
    %c0_8 = arith.constant 0 : index
    %c0_9 = arith.constant 0 : index
    %9 = vector.load %arg13[%c0_8, %c0_9] : memref<4x32xf32, #tpu.memory_space<vmem>>, vector<4x32xf32>
    %c0_i32_10 = arith.constant 0 : i32
    %c8_i32 = arith.constant 8 : i32
    %10 = arith.addi %c0_i32_10, %c8_i32 : i32
    %c1_i32 = arith.constant 1 : i32
    %11 = scf.for %arg14 = %c0_i32_10 to %10 step %c1_i32 iter_args(%arg15 = %9) -> (vector<4x32xf32>)  : i32 {
      %cst = arith.constant dense<0.000000e+00> : vector<4x32xf32>
      %16 = tpu.matmul %arg15, %3, %cst {dimension_numbers = #tpu.dot_dimension_numbers<[1], [0], [0], [1], [0, 0, 1, 1], [], []>} : vector<4x32xf32>, vector<32x32xf32>, vector<4x32xf32> -> vector<4x32xf32>
      %cst_16 = arith.constant dense<0.000000e+00> : vector<4x32xf32>
      %17 = tpu.matmul %arg15, %4, %cst_16 {dimension_numbers = #tpu.dot_dimension_numbers<[1], [0], [0], [1], [0, 0, 1, 1], [], []>} : vector<4x32xf32>, vector<32x32xf32>, vector<4x32xf32> -> vector<4x32xf32>
      %cst_17 = arith.constant dense<0.000000e+00> : vector<4x32xf32>
      %18 = tpu.matmul %arg15, %5, %cst_17 {dimension_numbers = #tpu.dot_dimension_numbers<[1], [0], [0], [1], [0, 0, 1, 1], [], []>} : vector<4x32xf32>, vector<32x32xf32>, vector<4x32xf32> -> vector<4x32xf32>
      %19 = arith.index_cast %arg14 : i32 to index
      %c0_18 = arith.constant 0 : index
      %c0_19 = arith.constant 0 : index
      %20 = vector.load %arg1[%19, %c0_18, %c0_19] : memref<8x4x32xf32, #tpu.memory_space<vmem>>, vector<1x4x32xf32>
      %21 = vector.shape_cast %20 : vector<1x4x32xf32> to vector<4x32xf32>
      %22 = arith.addf %21, %16 : vector<4x32xf32>
      %23 = arith.negf %22 : vector<4x32xf32>
      %24 = math.exp %23 : vector<4x32xf32>
      %cst_20 = arith.constant 1.000000e+00 : f32
      %25 = vector.broadcast %cst_20 : f32 to vector<4x32xf32>
      %26 = arith.addf %25, %24 : vector<4x32xf32>
      %27 = arith.divf %25, %26 : vector<4x32xf32>
      %28 = arith.index_cast %arg14 : i32 to index
      %c0_21 = arith.constant 0 : index
      %c0_22 = arith.constant 0 : index
      %29 = vector.load %arg2[%28, %c0_21, %c0_22] : memref<8x4x32xf32, #tpu.memory_space<vmem>>, vector<1x4x32xf32>
      %30 = vector.shape_cast %29 : vector<1x4x32xf32> to vector<4x32xf32>
      %31 = arith.addf %30, %17 : vector<4x32xf32>
      %32 = arith.negf %31 : vector<4x32xf32>
      %33 = math.exp %32 : vector<4x32xf32>
      %cst_23 = arith.constant 1.000000e+00 : f32
      %34 = vector.broadcast %cst_23 : f32 to vector<4x32xf32>
      %35 = arith.addf %34, %33 : vector<4x32xf32>
      %36 = arith.divf %34, %35 : vector<4x32xf32>
      %37 = arith.index_cast %arg14 : i32 to index
      %c0_24 = arith.constant 0 : index
      %c0_25 = arith.constant 0 : index
      %38 = vector.load %arg3[%37, %c0_24, %c0_25] : memref<8x4x32xf32, #tpu.memory_space<vmem>>, vector<1x4x32xf32>
      %39 = vector.shape_cast %38 : vector<1x4x32xf32> to vector<4x32xf32>
      %40 = arith.addf %18, %8 : vector<4x32xf32>
      %41 = arith.mulf %27, %40 : vector<4x32xf32>
      %42 = arith.addf %39, %41 : vector<4x32xf32>
      %43 = math.tanh %42 : vector<4x32xf32>
      %cst_26 = arith.constant 1.000000e+00 : f32
      %44 = vector.broadcast %cst_26 : f32 to vector<4x32xf32>
      %45 = arith.subf %44, %36 : vector<4x32xf32>
      %46 = arith.mulf %45, %43 : vector<4x32xf32>
      %47 = arith.mulf %36, %arg15 : vector<4x32xf32>
      %48 = arith.addf %46, %47 : vector<4x32xf32>
      scf.yield %48 : vector<4x32xf32>
    }
    %c8_i32_11 = arith.constant 8 : i32
    %c0_12 = arith.constant 0 : index
    %c0_13 = arith.constant 0 : index
    %12 = vector.load %arg13[%c0_12, %c0_13] : memref<4x32xf32, #tpu.memory_space<vmem>>, vector<4x32xf32>
    tpu.vector_store %arg13[%c0_12, %c0_13], %11 {strides = array<i32>} : memref<4x32xf32, #tpu.memory_space<vmem>>, vector<4x32xf32>,
    %c0_i32_14 = arith.constant 0 : i32
    %13 = arith.cmpi eq, %arg0, %c0_i32_14 : i32
    %14 = arith.extui %13 : i1 to i32
    %c0_i32_15 = arith.constant 0 : i32
    %15 = arith.cmpi ne, %14, %c0_i32_15 : i32
    scf.if %15 {
      %c0_16 = arith.constant 0 : index
      %c0_17 = arith.constant 0 : index
      %16 = vector.load %arg8[%c0_16, %c0_17] : memref<32x32xf32, #tpu.memory_space<vmem>>, vector<32x32xf32>
      %c0_18 = arith.constant 0 : index
      %c0_19 = arith.constant 0 : index
      %17 = vector.load %arg9[%c0_18, %c0_19] : memref<1x32xf32, #tpu.memory_space<vmem>>, vector<1x32xf32>
      %cst = arith.constant dense<0.000000e+00> : vector<4x32xf32>
      %18 = tpu.matmul %11, %16, %cst {dimension_numbers = #tpu.dot_dimension_numbers<[1], [0], [0], [1], [0, 0, 1, 1], [], []>} : vector<4x32xf32>, vector<32x32xf32>, vector<4x32xf32> -> vector<4x32xf32>
      %19 = vector.broadcast %17 : vector<1x32xf32> to vector<4x32xf32>
      %20 = arith.addf %18, %19 : vector<4x32xf32>
      %cst_20 = arith.constant 0.000000e+00 : f32
      %21 = vector.broadcast %cst_20 : f32 to vector<4x32xf32>
      %22 = arith.maximumf %20, %21 : vector<4x32xf32>
      %c0_21 = arith.constant 0 : index
      %c0_22 = arith.constant 0 : index
      %23 = vector.load %arg10[%c0_21, %c0_22] : memref<32x3xf32, #tpu.memory_space<vmem>>, vector<32x3xf32>
      %c0_23 = arith.constant 0 : index
      %c0_24 = arith.constant 0 : index
      %24 = vector.load %arg11[%c0_23, %c0_24] : memref<1x3xf32, #tpu.memory_space<vmem>>, vector<1x3xf32>
      %cst_25 = arith.constant dense<0.000000e+00> : vector<4x3xf32>
      %25 = tpu.matmul %22, %23, %cst_25 {dimension_numbers = #tpu.dot_dimension_numbers<[1], [0], [0], [1], [0, 0, 1, 1], [], []>} : vector<4x32xf32>, vector<32x3xf32>, vector<4x3xf32> -> vector<4x3xf32>
      %26 = vector.broadcast %24 : vector<1x3xf32> to vector<4x3xf32>
      %27 = arith.addf %25, %26 : vector<4x3xf32>
      %c0_26 = arith.constant 0 : index
      %c0_27 = arith.constant 0 : index
      %28 = vector.load %arg12[%c0_26, %c0_27] : memref<4x3xf32, #tpu.memory_space<vmem>>, vector<4x3xf32>
      tpu.vector_store %arg12[%c0_26, %c0_27], %27 {strides = array<i32>} : memref<4x3xf32, #tpu.memory_space<vmem>>, vector<4x3xf32>,
    } else {
    }
    return
  }
  func.func @transform_0(%arg0: i32) -> (i32, i32, i32) {
    %c0_i32 = arith.constant 0 : i32
    %c0_i32_0 = arith.constant 0 : i32
    %c0_i32_1 = arith.constant 0 : i32
    return %arg0, %c0_i32, %c0_i32_0 : i32, i32, i32
  }
  func.func @transform_1(%arg0: i32) -> (i32, i32, i32) {
    %c0_i32 = arith.constant 0 : i32
    %c0_i32_0 = arith.constant 0 : i32
    %c0_i32_1 = arith.constant 0 : i32
    return %arg0, %c0_i32, %c0_i32_0 : i32, i32, i32
  }
  func.func @transform_2(%arg0: i32) -> (i32, i32, i32) {
    %c0_i32 = arith.constant 0 : i32
    %c0_i32_0 = arith.constant 0 : i32
    %c0_i32_1 = arith.constant 0 : i32
    return %arg0, %c0_i32, %c0_i32_0 : i32, i32, i32
  }
  func.func @transform_3(%arg0: i32) -> (i32, i32) {
    %c0_i32 = arith.constant 0 : i32
    %c0_i32_0 = arith.constant 0 : i32
    %c0_i32_1 = arith.constant 0 : i32
    return %c0_i32, %c0_i32_0 : i32, i32
  }
  func.func @transform_4(%arg0: i32) -> (i32, i32) {
    %c0_i32 = arith.constant 0 : i32
    %c0_i32_0 = arith.constant 0 : i32
    %c0_i32_1 = arith.constant 0 : i32
    return %c0_i32, %c0_i32_0 : i32, i32
  }
  func.func @transform_5(%arg0: i32) -> (i32, i32) {
    %c0_i32 = arith.constant 0 : i32
    %c0_i32_0 = arith.constant 0 : i32
    %c0_i32_1 = arith.constant 0 : i32
    return %c0_i32, %c0_i32_0 : i32, i32
  }
  func.func @transform_6(%arg0: i32) -> (i32, i32) {
    %c0_i32 = arith.constant 0 : i32
    %c0_i32_0 = arith.constant 0 : i32
    %c0_i32_1 = arith.constant 0 : i32
    return %c0_i32, %c0_i32_0 : i32, i32
  }
  func.func @transform_7(%arg0: i32) -> (i32, i32) {
    %c0_i32 = arith.constant 0 : i32
    %c0_i32_0 = arith.constant 0 : i32
    %c0_i32_1 = arith.constant 0 : i32
    return %c0_i32, %c0_i32_0 : i32, i32
  }
  func.func @transform_8(%arg0: i32) -> (i32, i32) {
    %c0_i32 = arith.constant 0 : i32
    %c0_i32_0 = arith.constant 0 : i32
    %c0_i32_1 = arith.constant 0 : i32
    return %c0_i32, %c0_i32_0 : i32, i32
  }
  func.func @transform_9(%arg0: i32) -> (i32, i32) {
    %c0_i32 = arith.constant 0 : i32
    %c0_i32_0 = arith.constant 0 : i32
    %c0_i32_1 = arith.constant 0 : i32
    return %c0_i32, %c0_i32_0 : i32, i32
  }
  func.func @transform_10(%arg0: i32) -> (i32, i32) {
    %c0_i32 = arith.constant 0 : i32
    %c0_i32_0 = arith.constant 0 : i32
    %c0_i32_1 = arith.constant 0 : i32
    return %c0_i32, %c0_i32_0 : i32, i32
  }
  func.func @transform_11(%arg0: i32) -> (i32, i32) {
    %c0_i32 = arith.constant 0 : i32
    %c0_i32_0 = arith.constant 0 : i32
    %c0_i32_1 = arith.constant 0 : i32
    return %c0_i32, %c0_i32_0 : i32, i32
  }
}

</mosaic_0001>

<bundles_post_ra>
// kernel: gru_model_forward.1
= control target key start
LH: loop header
LB: loop body
LE: loop exit
PB: predicated region body
PF: predicated region fallthrough
CT: control target
= control target key end

     0   :  { %vm42_vm0 = vcmask 257024   ;;  %v329_v0 = vmov 0.0   ;;  %s458_s22 = smov 0   ;;  %s542_s0 = inlined_call_operand.vmem [shape: f32[8,4,32], index: 0, kind: input, shape index: {}]   ;;  %s543_s1 = inlined_call_operand.vmem [shape: f32[8,4,32], index: 1, kind: input, shape index: {}]   ;;  %s544_s2 = inlined_call_operand.vmem [shape: f32[8,4,32], index: 2, kind: input, shape index: {}]   ;;  %s545_s3 = inlined_call_operand.vmem [shape: f32[32,32], index: 3, kind: input, shape index: {}]   ;;  %s546_s4 = inlined_call_operand.vmem [shape: f32[32,32], index: 4, kind: input, shape index: {}]   ;;  %s547_s5 = inlined_call_operand.vmem [shape: f32[32,32], index: 5, kind: input, shape index: {}]   ;;  %s548_s7 = inlined_call_operand.vmem [shape: f32[32,32], index: 7, kind: input, shape index: {}]   ;;  %s549_s8 = inlined_call_operand.vmem [shape: f32[1,32], index: 8, kind: input, shape index: {}]   ;;  %s550_s9 = inlined_call_operand.vmem [shape: f32[32,3], index: 9, kind: input, shape index: {}]   ;;  %s551_s10 = inlined_call_operand.vmem [shape: f32[1,3], index: 10, kind: input, shape index: {}]   ;;  %s552_s11 = inlined_call_operand.vmem [shape: f32[4,3], index: 11, kind: output, shape index: {}]   ;;  %s553_s6 = inlined_call_operand.vmem [shape: f32[1,32], index: 6, kind: input, shape index: {}]  }
   0x1   :  { %43 = vst.msk [vmem:[#allocation2] sm:$0xf] %vm42_vm0, %v329_v0  ;;  %v394_v1 = vld [vmem:[%s545_s3] sm:$0xff]  ;;  %v399_v2 = vld [vmem:[%s545_s3 + $0x8] sm:$0xff]  ;;  %v404_v3 = vld [vmem:[%s545_s3 + $0x10] sm:$0xff] }
   0x2   :  { %v409_v4 = vld [vmem:[%s545_s3 + $0x18] sm:$0xff]  ;;  %v414_v5 = vld [vmem:[%s546_s4] sm:$0xff]  ;;  %v419_v6 = vld [vmem:[%s546_s4 + $0x8] sm:$0xff] }
   0x3   :  { %v424_v7 = vld [vmem:[%s546_s4 + $0x10] sm:$0xff]  ;;  %v429_v8 = vld [vmem:[%s546_s4 + $0x18] sm:$0xff]  ;;  %v434_v9 = vld [vmem:[%s547_s5] sm:$0xff] }
   0x4   :  { %v439_v10 = vld [vmem:[%s547_s5 + $0x8] sm:$0xff]  ;;  %v444_v11 = vld [vmem:[%s547_s5 + $0x10] sm:$0xff]  ;;  %v449_v12 = vld [vmem:[%s547_s5 + $0x18] sm:$0xff] }
   0x5   :  { %v454_v13 = vld [vmem:[%s553_s6] ss:$0 sm:$0xff] }
   0x8   :  { %v60_v14 = vld [vmem:[#allocation2] sm:$0xf]  }
   0x9 LB: > { %84 = vmatpush.msra.mxu0 %v409_v4  ;;  %104 = vmatpush.msra.mxu1 %v429_v8  ;;  %vm68_vm1 = vcmask 261120   ;;  %s485_s5 = sshll.u32 %s327_s22, 2  ;;  %s66_s22 = sadd.s32 1, %s327_s22   ;;  %s327_s22 = sphi %s458_s22, %s66_s22   ;;  %v323_v14 = vphi %v60_v14, %v554_v14  }
   0xa   : > { %171 = vmatpush.msra.mxu2 %v449_v12  ;;  %s113_s24 = scalar_lea.vmem %s542_s0, %s485_s5  ;;  %s135_s27 = scalar_lea.vmem %s543_s1, %s485_s5 }
   0xb   : > { %85 = vmatpush.msra.mxu0 %v404_v3  ;;  %105 = vmatpush.msra.mxu1 %v424_v7  ;;  %v114_v15 = vld [vmem:[%s113_s24] sm:$0xf]  ;;  %s157_s30 = scalar_lea.vmem %s544_s2, %s485_s5  ;;  %p63_p0 = scmp.ge.s32.totalorder %s66_s22, 8  }
   0xc   : > { %172 = vmatpush.msra.mxu2 %v444_v11  ;;  %v136_v16 = vld [vmem:[%s135_s27] sm:$0xf]  ;;  %v194_v57 = vld [vmem:[%s548_s7 + $0x18] sm:$0xff] (%p63_p0)  ;;  %v193_v58 = vld [vmem:[%s548_s7 + $0x10] sm:$0xff] (%p63_p0)  ;;  %vm255_vm10 = vcmask (%p63_p0), 19456  }
   0xd   : > { %86 = vmatpush.msra.mxu0 %v399_v2  ;;  %106 = vmatpush.msra.mxu1 %v419_v6  ;;  %v158_v44 = vld [vmem:[%s157_s30] sm:$0xf]  ;;  %v227_v59 = vld [vmem:[%s550_s9 + $0x18] sm:$0xff] (%p63_p0)  ;;  %v192_v60 = vld [vmem:[%s548_s7 + $0x8] sm:$0xff] (%p63_p0) }
   0xe   : > { %173 = vmatpush.msra.mxu2 %v439_v10  ;;  %v191_v61 = vld [vmem:[%s548_s7] sm:$0xff] (%p63_p0)  ;;  %v226_v62 = vld [vmem:[%s550_s9 + $0x10] sm:$0xff] (%p63_p0)  ;;  %v225_v63 = vld [vmem:[%s550_s9 + $0x8] sm:$0xff] (%p63_p0) }
   0xf   : > { %87 = vmatpush.msra.mxu0 %v394_v1  ;;  %107 = vmatpush.msra.mxu1 %v414_v5  ;;  %v224_v0 = vld [vmem:[%s550_s9] sm:$0xff] (%p63_p0) }
  0x10   : > { %275 = vmatmul.msk.f32.vlgmr.msra.gmra.mxu0 %vm68_vm1, %v323_v14  ;;  %276 = vmatmul.msk.f32.vlgmr.msra.gmra.mxu1 %vm68_vm1, %v323_v14  ;;  %v311_v1 = vld [vmem:[%s549_s8] ss:$0 sm:$0xff] (%p63_p0) }
  0x11   : > { %174 = vmatpush.msra.mxu2 %v434_v9  ;;  %215 = vmatpush.msra.mxu0 (%p63_p0), %v194_v57  ;;  %v312_v5 = vld [vmem:[%s551_s10] ss:$0 sm:$0xff] (%p63_p0) }
  0x12   : > { %280 = vmatmul.msk.f32.vlgmr.msra.gmra.mxu2 %vm68_vm1, %v323_v14  ;;  %247 = vmatpush.msra.mxu1 (%p63_p0), %v227_v59 }
  0x13   :  { %216 = vmatpush.msra.mxu0 (%p63_p0), %v193_v58 }
  0x14   :  { %248 = vmatpush.msra.mxu1 (%p63_p0), %v226_v62 }
  0x15   :  { %217 = vmatpush.msra.mxu0 (%p63_p0), %v192_v60 }
  0x16   :  { %249 = vmatpush.msra.mxu1 (%p63_p0), %v225_v63 }
  0x17   :  { %218 = vmatpush.msra.mxu0 (%p63_p0), %v191_v61 }
  0x18   :  { %250 = vmatpush.msra.mxu1 (%p63_p0), %v224_v0 }
  0x8d   : > { %v89_v17 = vpop.f32.mrf.mxu0  ;;  %v109_v18 = vpop.f32.mrf.mxu1 }
  0x8e   : > { %v115_v19 = vadd.f32 %v114_v15, %v89_v17  ;;  %v137_v20 = vadd.f32 %v136_v16, %v109_v18 }
  0x90   : > { %v278_v21 = vmul.f32 -1.442695, %v115_v19  ;;  %v279_v22 = vmul.f32 -1.442695, %v137_v20 }
  0x92   : > { %301 = vpow2.f32 %v278_v21 }
  0x93   : > { %303 = vpow2.f32 %v279_v22 }
  0x95   : > { %v176_v34 = vpop.f32.mrf.mxu2 }
  0x96   : > { %v177_v39 = vadd.f32 %v454_v13, %v176_v34 }
  0x98   : > { %v302_v23 = vpop.eup %301 }
  0x99   : > { %v304_v24 = vpop.eup %303  ;;  %v119_v25 = vadd.f32 1.0, %v302_v23 }
  0x9a   : > { %v141_v26 = vadd.f32 1.0, %v304_v24 }
  0x9b   : > { %305 = vrcp.f32 %v119_v25  ;;  %v131_v33 = vand.u32 2147483648, %v119_v25  ;;  %v129_v36 = vand.u32 2147483647, %v119_v25  ;;  %vm125_vm3 = vweird.f32 %v119_v25 }
  0x9c   : > { %307 = vrcp.f32 %v141_v26  ;;  %vm147_vm6 = vweird.f32 %v141_v26  ;;  %v153_v45 = vand.u32 2147483648, %v141_v26  ;;  %v151_v47 = vand.u32 2147483647, %v141_v26 }
  0x9d   : > { %v132_v40 = vor.u32 1.1754944e-38, %v131_v33  ;;  %vm130_vm5 = vcmp.eq.f32.partialorder %v129_v36, 8.507059e+37 }
  0x9e   : > { %v154_v50 = vor.u32 1.1754944e-38, %v153_v45  ;;  %vm152_vm9 = vcmp.eq.f32.partialorder %v151_v47, 8.507059e+37 }
  0xa1   : > { %v306_v27 = vpop.eup %305 }
  0xa2   : > { %v308_v28 = vpop.eup %307  ;;  %v121_v29 = vmul.f32 %v306_v27, %v119_v25  ;;  %vm126_vm2 = vweird.f32 %v306_v27 }
  0xa3   : > { %v143_v30 = vmul.f32 %v308_v28, %v141_v26  ;;  %vm127_vm4 = vmor %vm125_vm3, %vm126_vm2  ;;  %vm148_vm7 = vweird.f32 %v308_v28 }
  0xa4   : > { %v122_v31 = vsub.f32 1.0, %v121_v29  ;;  %vm149_vm8 = vmor %vm147_vm6, %vm148_vm7 }
  0xa5   : > { %v144_v32 = vsub.f32 1.0, %v143_v30 }
  0xa6   : > { %v123_v35 = vmul.f32 %v306_v27, %v122_v31 }
  0xa7   : > { %v145_v37 = vmul.f32 %v308_v28, %v144_v32 }
  0xa8   : > { %v124_v38 = vadd.f32 %v306_v27, %v123_v35 }
  0xa9   : > { %v146_v42 = vadd.f32 %v308_v28, %v145_v37 }
  0xaa   : > { %v128_v41 = vsel %vm127_vm4, %v306_v27, %v124_v38 }
  0xab   : > { %v133_v43 = vsel %vm130_vm5, %v132_v40, %v128_v41  ;;  %v150_v49 = vsel %vm149_vm8, %v308_v28, %v146_v42 }
  0xac   : > { %v179_v46 = vmul.f32 %v177_v39, %v133_v43  ;;  %v155_v51 = vsel %vm152_vm9, %v154_v50, %v150_v49 }
  0xad   : > { %v182_v52 = vsub.f32 1.0, %v155_v51  ;;  %v184_v55 = vmul.f32 %v323_v14, %v155_v51 }
  0xae   : > { %v180_v48 = vadd.f32 %v179_v46, %v158_v44 }
  0xb0   : > { %309 = vtanh.f32 %v180_v48 }
  0xb6   : > { %v310_v53 = vpop.eup %309 }
  0xb7   : > { %v183_v54 = vmul.f32 %v310_v53, %v182_v52  ;;  %65 = sbr.rel (!%p63_p0) target bundleno = 9 (0x9), region = 82 }
  0xb9   : > { %v185_v56 = vadd.f32 %v184_v55, %v183_v54  }
  0xbb   : > { %v554_v14 = vmov %v185_v56  ;;  %187 = vst.msk [vmem:[#allocation2] sm:$0xf] (%p63_p0), %vm42_vm0, %v185_v56  ;;  %281 = vmatmul.msk.f32.vlgmr.msra.gmra.mxu0 (%p63_p0), %vm68_vm1, %v185_v56 }
 0x138   :  { %v220_v2 = vpop.f32.mrf.mxu0 }
 0x139   :  { %v221_v3 = vadd.f32 %v311_v1, %v220_v2 }
 0x13b   :  { %v223_v4 = vmax.f32 %v221_v3, 0.0 }
 0x13d   :  { %282 = vmatmul.msk.f32.vlgmr.msra.gmra.mxu1 %vm68_vm1, %v223_v4 }
 0x1ba   :  { %v252_v6 = vpop.f32.mrf.mxu1 }
 0x1bb   :  { %v253_v7 = vadd.f32 %v312_v5, %v252_v6 }
 0x1bd   :  { %256 = vst.msk [vmem:[%s552_s11] sm:$0xf] %vm255_vm10, %v253_v7 }

</bundles_post_ra>
